<compile_context>
chip_gen: v7x
topology: tpu7x:2x2x1
jax: 0.10.0
libtpu: 0.0.40
codegen_flags: <defaults>
</compile_context>

<pallas_src>
import functools

import jax
import jax.numpy as jnp
from jax.experimental import pallas as pl
from jax.experimental.pallas import tpu as pltpu


def _round_up(v, m):
    return (v + m - 1) // m * m


def _largest_tile(c_p, max_tile):
    """Largest multiple of 128 that divides c_p (a 128-multiple) and is <= max_tile."""
    t = max(128, min(max_tile, c_p))
    t -= t % 128
    while c_p % t:
        t -= 128
    return t


def _next_smaller_tile(c_p, cur):
    for t in range(cur - 128, 127, -128):
        if c_p % t == 0:
            return t
    return 128


def _tpu_vmem_budget():
    """Best-effort per-core usable VMEM budget (bytes): ~75% of capacity."""
    vmem = None
    try:
        vmem = int(pltpu.get_tpu_info().vmem_capacity_bytes)
    except Exception:
        vmem = None
    if vmem is None:
        kind = ""
        try:
            kind = jax.devices()[0].device_kind.lower()
        except Exception:
            pass
        vmem = (64 << 20) if "v7" in kind else (128 << 20)
    return (vmem * 3) // 4


def _multi_tensorcore_hint():
    """True on chips with >1 TensorCore per chip (v7x, megacore v4/v5p)."""
    try:
        kind = jax.devices()[0].device_kind.lower()
    except Exception:
        return False
    return any(t in kind for t in ("v7", "v4", "v5p"))


def _plan(n_p, c_in_p, c_out_p, x_item, mm_item, out_item, budget, multi_tc,
          max_tcout=512):
    """Choose (tcout, tk, x_resident) sized to the VMEM budget."""
    max_tk = 1024 if budget >= (80 << 20) else 512   # larger tk on 128-MiB chips
    tcout = _largest_tile(c_out_p, max_tcout)
    if multi_tc:
        # Ensure >= 2 C_out tiles so the "parallel" axis feeds both TensorCores.
        while c_out_p // tcout < 2 and tcout > 128:
            tcout = _next_smaller_tile(c_out_p, tcout)
    tk = _largest_tile(c_in_p, max_tk)
    x_resident = True

    def est(resident, tk_, tcout_):
        x_bytes = 2 * n_p * (c_in_p if resident else tk_) * x_item  # double-buffered
        w_bytes = 2 * tk_ * tcout_ * mm_item
        o_bytes = 2 * n_p * tcout_ * out_item
        acc_bytes = n_p * tcout_ * 4                                # single-buffered scratch
        misc = 4 * tcout_ * 4 + (2 << 20)                           # gamma/beta + headroom
        return x_bytes + w_bytes + o_bytes + acc_bytes + misc

    # Size the tiles to the budget instead of clamping the VMEM limit.
    while est(x_resident, tk, tcout) > budget:
        if x_resident and 2 * n_p * c_in_p * x_item > budget // 2:
            x_resident = False
        elif tk > 128:
            tk = _next_smaller_tile(c_in_p, tk)
        elif x_resident:
            x_resident = False
        elif tcout > 128:
            tcout = _next_smaller_tile(c_out_p, tcout)
        else:
            # TODO(synk): two-pass N-tiled scheme (accumulate per-feature
            # sum/sumsq over N tiles, then a second pass applying the folded
            # scale/shift) for N so large that even an (N, 128) f32
            # accumulator does not fit VMEM.
            break
    return tcout, tk, x_resident, est(x_resident, tk, tcout)


def _linear_bn_kernel(x_ref, w_ref, gamma_ref, beta_ref, o_ref, acc_ref, *,
                      eps, act, inv_n, tk, x_resident, mm_dtype):
    k = pl.program_id(1)

    @pl.when(k == 0)
    def _():
        acc_ref[...] = jnp.zeros_like(acc_ref)

    if x_resident:
        off = pl.multiple_of(k * tk, 128)
        xk = x_ref[:, pl.ds(off, tk)]          # x stays resident; slice the k-chunk
    else:
        xk = x_ref[...]
    # Cast to the MXU dtype in-kernel (x is read from HBM once, in its native
    # dtype, with no wrapper-side cast pass); accumulate in f32.
    acc_ref[...] += jnp.dot(xk.astype(mm_dtype), w_ref[...],
                            preferred_element_type=jnp.float32)

    @pl.when(k == pl.num_programs(1) - 1)
    def _():
        y = acc_ref[...]                                      # (N_p, TCOUT) f32
        # One-pass batch statistics (biased variance, as BatchNorm1d uses for
        # normalization).  Padded zero rows contribute 0 to both sums and
        # inv_n uses the true N, so the statistics are exact.
        s1 = jnp.sum(y, axis=0, keepdims=True) * inv_n        # mean
        s2 = jnp.sum(y * y, axis=0, keepdims=True) * inv_n    # E[y^2]
        var = jnp.maximum(s2 - s1 * s1, 0.0)                  # guard f32 cancellation
        scale = gamma_ref[...] * jax.lax.rsqrt(var + eps)     # EUP rsqrt
        shift = beta_ref[...] - s1 * scale
        out = y * scale + shift
        if act == "relu":
            out = jnp.maximum(out, 0.0)
        o_ref[...] = out.astype(o_ref.dtype)


def linear_bn(x, w_t, b, gamma, beta, *, eps=1e-6, act=None,
              matmul_dtype=jnp.bfloat16, out_dtype=jnp.float32,
              max_tile_cout=512):
    """LinearBn forward (training-mode BatchNorm semantics, eps=1e-6).

    x:      (N, C_in)  float32
    w_t:    (C_in, C_out)  == linear.weight.T
    b:      (1, C_out) linear bias -- accepted for API fidelity but unused:
            training-mode BN subtracts the batch mean, which cancels it exactly.
            # TODO(synk): fold b back in (and emit batch mean/var for the
            # running-stats / eval-mode path) if needed.
    gamma, beta: (1, C_out) BatchNorm affine parameters.
    """
    del b
    n, c_in = x.shape
    c_out = w_t.shape[1]

    # Minimal padding: C dims to the next multiple of 128 (lane-dense stores),
    # N to a multiple of 16 (bf16 sublane packing).  Tiles are 128-multiple
    # divisors of the padded dims, so no extra tile-induced padding.
    c_in_p = _round_up(c_in, 128)
    c_out_p = _round_up(c_out, 128)
    n_p = _round_up(n, 16)

    budget = _tpu_vmem_budget()
    multi_tc = _multi_tensorcore_hint()
    x_item = jnp.dtype(x.dtype).itemsize
    mm_item = jnp.dtype(matmul_dtype).itemsize
    out_item = jnp.dtype(out_dtype).itemsize
    tcout, tk, x_resident, _est = _plan(n_p, c_in_p, c_out_p, x_item, mm_item,
                                        out_item, budget, multi_tc,
                                        max_tcout=max_tile_cout)

    def pad2(a, rows, cols):
        pr, pc = rows - a.shape[0], cols - a.shape[1]
        return jnp.pad(a, ((0, pr), (0, pc))) if (pr or pc) else a

    # x keeps its dtype (in-kernel cast); W is a reused weight, pre-cast once.
    x_p = pad2(x, n_p, c_in_p)
    w_p = pad2(w_t, c_in_p, c_out_p).astype(matmul_dtype)
    gamma_p = pad2(gamma.astype(jnp.float32), 1, c_out_p)
    beta_p = pad2(beta.astype(jnp.float32), 1, c_out_p)

    grid = (c_out_p // tcout, c_in_p // tk)

    if x_resident:
        x_spec = pl.BlockSpec((n_p, c_in_p), lambda j, k: (0, 0))
    else:
        x_spec = pl.BlockSpec((n_p, tk), lambda j, k: (0, k))

    kernel = functools.partial(_linear_bn_kernel, eps=eps, act=act,
                               inv_n=1.0 / n, tk=tk, x_resident=x_resident,
                               mm_dtype=matmul_dtype)

    out_p = pl.pallas_call(
        kernel,
        out_shape=jax.ShapeDtypeStruct((n_p, c_out_p), out_dtype),
        grid=grid,
        in_specs=[
            x_spec,                                            # x (resident or k-tiled)
            pl.BlockSpec((tk, tcout), lambda j, k: (k, j)),    # W^T
            pl.BlockSpec((1, tcout), lambda j, k: (0, j)),     # gamma
            pl.BlockSpec((1, tcout), lambda j, k: (0, j)),     # beta
        ],
        out_specs=pl.BlockSpec((n_p, tcout), lambda j, k: (0, j)),
        scratch_shapes=[pltpu.VMEM((n_p, tcout), jnp.float32)],
        compiler_params=pltpu.CompilerParams(
            dimension_semantics=("parallel", "arbitrary"),
            # Tiles were sized to fit `budget`; the limit is not clamped below
            # the footprint.
            vmem_limit_bytes=int(budget),
        ),
    )(x_p, w_p, gamma_p, beta_p)

    return out_p[:n, :c_out]


def _reference(x, w_t, b, gamma, beta, *, eps=1e-6, act=None, matmul_dtype=None):
    if matmul_dtype is not None:
        y = jnp.dot(x.astype(matmul_dtype), w_t.astype(matmul_dtype),
                    preferred_element_type=jnp.float32)
    else:
        y = x @ w_t
    y = y + b
    mean = jnp.mean(y, axis=0, keepdims=True)
    var = jnp.mean((y - mean) ** 2, axis=0, keepdims=True)
    out = (y - mean) / jnp.sqrt(var + eps) * gamma + beta
    if act == "relu":
        out = jnp.maximum(out, 0.0)
    return out


def _make_inputs(key, n, c_in, c_out):
    kx, kw, kb, kg, kbeta = jax.random.split(key, 5)
    bound = 1.0 / jnp.sqrt(jnp.float32(c_in))
    x = jax.random.normal(kx, (n, c_in), dtype=jnp.float32)
    w = jax.random.uniform(kw, (c_out, c_in), minval=-bound, maxval=bound,
                           dtype=jnp.float32)             # nn.Linear weight (out, in)
    b = jax.random.uniform(kb, (1, c_out), minval=-bound, maxval=bound,
                           dtype=jnp.float32)
    gamma = 1.0 + 0.1 * jax.random.normal(kg, (1, c_out), dtype=jnp.float32)
    beta = 0.1 * jax.random.normal(kbeta, (1, c_out), dtype=jnp.float32)
    return x, w.T, b, gamma, beta                          # w_t = (C_in, C_out)


if __name__ == "__main__":
    key = jax.random.PRNGKey(0)
    k1, k2 = jax.random.split(key)

    # Small shapes consistent with LinearBn(in_channel, out_channel) applied
    # to a 2-D (batch, features) input, as in AttentiveFP.
    N, C_IN, C_OUT = 8, 32, 64
    x, w_t, b, gamma, beta = _make_inputs(k1, N, C_IN, C_OUT)

    # Fast path: bf16 MXU operands, f32 statistics / epilogue / output.
    out_bf16 = jax.block_until_ready(
        linear_bn(x, w_t, b, gamma, beta, act="relu", matmul_dtype=jnp.bfloat16))
    # Exact path: f32 everywhere (tight semantic validation).
    out_f32 = jax.block_until_ready(
        linear_bn(x, w_t, b, gamma, beta, act="relu", matmul_dtype=jnp.float32))
    # bf16 output path (halved HBM writeback) -- just exercise + loose check.
    out_bf16_out = jax.block_until_ready(
        linear_bn(x, w_t, b, gamma, beta, act="relu",
                  matmul_dtype=jnp.bfloat16, out_dtype=jnp.bfloat16))

    ref_f32 = _reference(x, w_t, b, gamma, beta, act="relu")
    ref_bf16 = _reference(x, w_t, b, gamma, beta, act="relu",
                          matmul_dtype=jnp.bfloat16)

    assert out_f32.shape == (N, C_OUT) and out_bf16.shape == (N, C_OUT)
    assert jnp.allclose(out_f32, ref_f32, atol=1e-4, rtol=1e-4), \
        "f32 kernel mismatch vs reference"
    assert jnp.allclose(out_bf16, ref_bf16, atol=5e-3, rtol=5e-3), \
        "bf16 kernel mismatch vs bf16 reference"
    # Loose check vs full-precision reference: bf16 matmul error is amplified
    # by the batch normalization, so only a coarse tolerance is meaningful.
    assert jnp.allclose(out_bf16, ref_f32, atol=1e-1, rtol=5e-2), \
        "bf16 kernel mismatch vs f32 reference"
    assert jnp.allclose(out_bf16_out.astype(jnp.float32), ref_f32,
                        atol=1.5e-1, rtol=1e-1), \
        "bf16-output kernel mismatch vs f32 reference"

    # Non-power-of-two shape: exercises minimal 128-padding + multi-tile grid.
    N2, C_IN2, C_OUT2 = 12, 200, 136
    x2, w_t2, b2, gamma2, beta2 = _make_inputs(k2, N2, C_IN2, C_OUT2)
    out2 = jax.block_until_ready(
        linear_bn(x2, w_t2, b2, gamma2, beta2, act="relu",
                  matmul_dtype=jnp.float32))
    ref2 = _reference(x2, w_t2, b2, gamma2, beta2, act="relu")
    assert out2.shape == (N2, C_OUT2)
    assert jnp.allclose(out2, ref2, atol=1e-4, rtol=1e-4), \
        "padded-shape f32 kernel mismatch vs reference"

    print("KERNEL_OK")
</pallas_src>

<mosaic_0001>
module attributes {stable_mosaic.version = 11 : i64} {
  func.func @_linear_bn_kernel(%arg0: i32, %arg1: i32, %arg2: memref<16x128xf32, #tpu.memory_space<vmem>>, %arg3: memref<128x128xbf16, #tpu.memory_space<vmem>>, %arg4: memref<1x128xf32, #tpu.memory_space<vmem>>, %arg5: memref<1x128xf32, #tpu.memory_space<vmem>>, %arg6: memref<16x128xf32, #tpu.memory_space<vmem>>, %arg7: memref<16x128xf32, #tpu.memory_space<vmem>>) attributes {dimension_semantics = [#tpu.dimension_semantics<parallel>, #tpu.dimension_semantics<arbitrary>], iteration_bounds = array<i64: 1, 1>, scalar_prefetch = 0 : i64, scratch_operands = 1 : i64, tpu.core_type = #tpu.core_type<tc>, window_params = [{pipeline_mode = #tpu.pipeline_mode<synchronous>, transform_indices = @transform_0, window_bounds = array<i64: 16, 128>}, {transform_indices = @transform_1, window_bounds = array<i64: 128, 128>}, {transform_indices = @transform_2, window_bounds = array<i64: 1, 128>}, {transform_indices = @transform_3, window_bounds = array<i64: 1, 128>}, {transform_indices = @transform_4, window_bounds = array<i64: 16, 128>}]} {
    %c0_i32 = arith.constant 0 : i32
    %0 = arith.cmpi eq, %arg1, %c0_i32 : i32
    %1 = arith.extui %0 : i1 to i32
    %c0_i32_0 = arith.constant 0 : i32
    %2 = arith.cmpi ne, %1, %c0_i32_0 : i32
    scf.if %2 {
      %cst_9 = arith.constant 0.000000e+00 : f32
      %16 = vector.broadcast %cst_9 : f32 to vector<16x128xf32>
      %c0_10 = arith.constant 0 : index
      %c0_11 = arith.constant 0 : index
      %17 = vector.load %arg7[%c0_10, %c0_11] : memref<16x128xf32, #tpu.memory_space<vmem>>, vector<16x128xf32>
      tpu.vector_store %arg7[%c0_10, %c0_11], %16 {strides = array<i32>} : memref<16x128xf32, #tpu.memory_space<vmem>>, vector<16x128xf32>,
    } else {
    }
    %c128_i32 = arith.constant 128 : i32
    %3 = arith.muli %arg1, %c128_i32 : i32
    %4 = tpu.assume_multiple %3, 128 : i32
    %c0 = arith.constant 0 : index
    %5 = arith.index_cast %4 : i32 to index
    %6 = vector.load %arg2[%c0, %5] : memref<16x128xf32, #tpu.memory_space<vmem>>, vector<16x128xf32>
    %c0_1 = arith.constant 0 : index
    %c0_2 = arith.constant 0 : index
    %7 = vector.load %arg7[%c0_1, %c0_2] : memref<16x128xf32, #tpu.memory_space<vmem>>, vector<16x128xf32>
    %8 = arith.truncf %6 : vector<16x128xf32> to vector<16x128xbf16>
    %c0_3 = arith.constant 0 : index
    %c0_4 = arith.constant 0 : index
    %9 = vector.load %arg3[%c0_3, %c0_4] : memref<128x128xbf16, #tpu.memory_space<vmem>>, vector<128x128xbf16>
    %cst = arith.constant dense<0.000000e+00> : vector<16x128xf32>
    %10 = tpu.matmul %8, %9, %cst {dimension_numbers = #tpu.dot_dimension_numbers<[1], [0], [0], [1], [0, 0, 1, 1], [], []>} : vector<16x128xbf16>, vector<128x128xbf16>, vector<16x128xf32> -> vector<16x128xf32>
    %11 = arith.addf %7, %10 : vector<16x128xf32>
    %c0_5 = arith.constant 0 : index
    %c0_6 = arith.constant 0 : index
    %12 = vector.load %arg7[%c0_5, %c0_6] : memref<16x128xf32, #tpu.memory_space<vmem>>, vector<16x128xf32>
    tpu.vector_store %arg7[%c0_5, %c0_6], %11 {strides = array<i32>} : memref<16x128xf32, #tpu.memory_space<vmem>>, vector<16x128xf32>,
    %c0_i32_7 = arith.constant 0 : i32
    %13 = arith.cmpi eq, %arg1, %c0_i32_7 : i32
    %14 = arith.extui %13 : i1 to i32
    %c0_i32_8 = arith.constant 0 : i32
    %15 = arith.cmpi ne, %14, %c0_i32_8 : i32
    scf.if %15 {
      %c0_9 = arith.constant 0 : index
      %c0_10 = arith.constant 0 : index
      %16 = vector.load %arg7[%c0_9, %c0_10] : memref<16x128xf32, #tpu.memory_space<vmem>>, vector<16x128xf32>
      %cst_11 = arith.constant dense<0.000000e+00> : vector<128xf32>
      %17 = vector.multi_reduction <add>, %16, %cst_11 [0] : vector<16x128xf32> to vector<128xf32>
      %18 = vector.shape_cast %17 : vector<128xf32> to vector<1x128xf32>
      %cst_12 = arith.constant 1.250000e-01 : f32
      %19 = vector.broadcast %cst_12 : f32 to vector<1x128xf32>
      %20 = arith.mulf %18, %19 : vector<1x128xf32>
      %21 = arith.mulf %16, %16 : vector<16x128xf32>
      %cst_13 = arith.constant dense<0.000000e+00> : vector<128xf32>
      %22 = vector.multi_reduction <add>, %21, %cst_13 [0] : vector<16x128xf32> to vector<128xf32>
      %23 = vector.shape_cast %22 : vector<128xf32> to vector<1x128xf32>
      %cst_14 = arith.constant 1.250000e-01 : f32
      %24 = vector.broadcast %cst_14 : f32 to vector<1x128xf32>
      %25 = arith.mulf %23, %24 : vector<1x128xf32>
      %26 = arith.mulf %20, %20 : vector<1x128xf32>
      %27 = arith.subf %25, %26 : vector<1x128xf32>
      %cst_15 = arith.constant 0.000000e+00 : f32
      %28 = vector.broadcast %cst_15 : f32 to vector<1x128xf32>
      %29 = arith.maximumf %27, %28 : vector<1x128xf32>
      %c0_16 = arith.constant 0 : index
      %c0_17 = arith.constant 0 : index
      %30 = vector.load %arg4[%c0_16, %c0_17] : memref<1x128xf32, #tpu.memory_space<vmem>>, vector<1x128xf32>
      %cst_18 = arith.constant 9.99999997E-7 : f32
      %31 = vector.broadcast %cst_18 : f32 to vector<1x128xf32>
      %32 = arith.addf %29, %31 : vector<1x128xf32>
      %33 = math.rsqrt %32 : vector<1x128xf32>
      %34 = arith.mulf %30, %33 : vector<1x128xf32>
      %c0_19 = arith.constant 0 : index
      %c0_20 = arith.constant 0 : index
      %35 = vector.load %arg5[%c0_19, %c0_20] : memref<1x128xf32, #tpu.memory_space<vmem>>, vector<1x128xf32>
      %36 = arith.mulf %20, %34 : vector<1x128xf32>
      %37 = arith.subf %35, %36 : vector<1x128xf32>
      %38 = vector.broadcast %34 : vector<1x128xf32> to vector<16x128xf32>
      %39 = arith.mulf %16, %38 : vector<16x128xf32>
      %40 = vector.broadcast %37 : vector<1x128xf32> to vector<16x128xf32>
      %41 = arith.addf %39, %40 : vector<16x128xf32>
      %cst_21 = arith.constant 0.000000e+00 : f32
      %42 = vector.broadcast %cst_21 : f32 to vector<16x128xf32>
      %43 = arith.maximumf %41, %42 : vector<16x128xf32>
      %c0_22 = arith.constant 0 : index
      %c0_23 = arith.constant 0 : index
      %44 = vector.load %arg6[%c0_22, %c0_23] : memref<16x128xf32, #tpu.memory_space<vmem>>, vector<16x128xf32>
      tpu.vector_store %arg6[%c0_22, %c0_23], %43 {strides = array<i32>} : memref<16x128xf32, #tpu.memory_space<vmem>>, vector<16x128xf32>,
    } else {
    }
    return
  }
  func.func @transform_0(%arg0: i32, %arg1: i32) -> (i32, i32) {
    %c0_i32 = arith.constant 0 : i32
    %c0_i32_0 = arith.constant 0 : i32
    %c0_i32_1 = arith.constant 0 : i32
    return %c0_i32, %c0_i32_0 : i32, i32
  }
  func.func @transform_1(%arg0: i32, %arg1: i32) -> (i32, i32) {
    %c0_i32 = arith.constant 0 : i32
    return %arg1, %arg0 : i32, i32
  }
  func.func @transform_2(%arg0: i32, %arg1: i32) -> (i32, i32) {
    %c0_i32 = arith.constant 0 : i32
    %c0_i32_0 = arith.constant 0 : i32
    return %c0_i32, %arg0 : i32, i32
  }
  func.func @transform_3(%arg0: i32, %arg1: i32) -> (i32, i32) {
    %c0_i32 = arith.constant 0 : i32
    %c0_i32_0 = arith.constant 0 : i32
    return %c0_i32, %arg0 : i32, i32
  }
  func.func @transform_4(%arg0: i32, %arg1: i32) -> (i32, i32) {
    %c0_i32 = arith.constant 0 : i32
    %c0_i32_0 = arith.constant 0 : i32
    return %c0_i32, %arg0 : i32, i32
  }
}

</mosaic_0001>

<bundles_post_ra>
// kernel: tpu_custom_call.1
= control target key start
LH: loop header
LB: loop body
LE: loop exit
PB: predicated region body
PF: predicated region fallthrough
CT: control target
= control target key end

     0   :  { %9 = vsyncpa [#allocation4], 0  ;;  %s545_s0 = inlined_call_operand.hbm [shape: f32[16,128], index: 0, kind: input, shape index: {}]   ;;  %s546_s1 = inlined_call_operand.hbm [shape: bf16[128,128], index: 1, kind: input, shape index: {}]   ;;  %s547_s2 = inlined_call_operand.hbm [shape: f32[1,128], index: 2, kind: input, shape index: {}]   ;;  %s548_s3 = inlined_call_operand.hbm [shape: f32[1,128], index: 3, kind: input, shape index: {}]   ;;  %s549_s4 = inlined_call_operand.hbm [shape: f32[16,128], index: 4, kind: output, shape index: {}]  }
   0x1   :  { %10 = vsyncpa [#allocation7], 0 }
   0x2   :  { %11 = vsyncpa [#allocation10], 0 }
   0x3   :  { %12 = vsyncpa [#allocation5], 0  ;;  %s443_s15 = smov [#allocation6]   ;;  %s325_s19 = scalar_lea.hbm %s546_s1, 1024 }
   0x4   :  { %s30_s16 = sshll.u32 %s443_s15, 4  ;;  %p326_p0 = scmp.ne.s32.totalorder %s546_s1, %s325_s19  ;;  %s31_s16 = int_to_ptr.vmem [resolvable:$true] %s30_s16 }
   0x5   :  { %p329_p1 = scmp.lt.u32.totalorder %s325_s19, %s546_s1 }
   0x7   :  { %p331_p2 = pnand %p329_p1, %p326_p0 }
   0x9   :  { %334 = shalt.err (!%p331_p2)
}
   0xa   :  { %s335_s24 = scalar_lea.vmem %s31_s16, 1024  ;;  %p340_p4 = scmp.lt.s32.totalorder %s31_s16, %s31_s16 }
   0xb   :  { %p336_p3 = scmp.ne.s32.totalorder %s31_s16, %s335_s24  ;;  %p341_p5 = scmp.lt.s32.totalorder %s335_s24, %s335_s24 }
   0xd   :  { %p342_p6 = por %p341_p5, %p340_p4 }
   0xf   :  { %p343_p7 = pnand %p342_p6, %p336_p3 }
  0x11   :  { %346 = shalt.err (!%p343_p7)
}
  0x12   :  { %s444_s25 = smov 64   ;;  %s445_s26 = smov 4  }
  0x13   :  { %36 = dma.hbm_to_vmem [thread:$0]  %s546_s1, 1024, %s31_s16, [#allocation7], %s444_s25, %s444_s25, %s445_s26  }
  0x14   :  { %s446_s29 = smov [#allocation3]   ;;  %s347_s7 = scalar_lea.hbm %s545_s0, 256 }
  0x15   :  { %s18_s30 = sshll.u32 %s446_s29, 4  ;;  %p348_p8 = scmp.ne.s32.totalorder %s545_s0, %s347_s7  ;;  %s19_s30 = int_to_ptr.vmem [resolvable:$true] %s18_s30 }
  0x16   :  { %p351_p9 = scmp.lt.u32.totalorder %s347_s7, %s545_s0 }
  0x18   :  { %p353_p10 = pnand %p351_p9, %p348_p8 }
  0x1a   :  { %356 = shalt.err (!%p353_p10)
}
  0x1b   :  { %s357_s12 = scalar_lea.vmem %s19_s30, 256  ;;  %p362_p12 = scmp.lt.s32.totalorder %s19_s30, %s19_s30 }
  0x1c   :  { %p358_p11 = scmp.ne.s32.totalorder %s19_s30, %s357_s12  ;;  %p363_p13 = scmp.lt.s32.totalorder %s357_s12, %s357_s12 }
  0x1e   :  { %p364_p0 = por %p363_p13, %p362_p12 }
  0x20   :  { %p365_p1 = pnand %p364_p0, %p358_p11 }
  0x22   :  { %368 = shalt.err (!%p365_p1)
}
  0x23   :  { %s447_s1 = smov 128   ;;  %s448_s13 = smov 8  }
  0x24   :  { %24 = dma.hbm_to_vmem [thread:$0]  %s545_s0, 256, %s19_s30, [#allocation4], %s447_s1, %s447_s1, %s448_s13  }
  0x25   :  { %s449_s16 = smov [#allocation8]   ;;  %s450_s18 = smov [#allocation9]  }
  0x26   :  { %s43_s17 = sshll.u32 %s449_s16, 4  ;;  %s53_s19 = sshll.u32 %s450_s18, 4  ;;  %s44_s17 = int_to_ptr.vmem [resolvable:$true] %s43_s17  ;;  %s54_s19 = int_to_ptr.vmem [resolvable:$true] %s53_s19 }
  0x27   :  { %s369_s22 = scalar_lea.hbm %s547_s2, 16 }
  0x28   :  { %p370_p2 = scmp.ne.s32.totalorder %s547_s2, %s369_s22  ;;  %p373_p3 = scmp.lt.u32.totalorder %s369_s22, %s547_s2 }
  0x2a   :  { %p375_p4 = pnand %p373_p3, %p370_p2 }
  0x2c   :  { %378 = shalt.err (!%p375_p4)
}
  0x2d   :  { %s379_s0 = scalar_lea.vmem %s44_s17, 16  ;;  %s383_s27 = scalar_lea.vmem %s44_s17, 32 }
  0x2e   :  { %p380_p5 = scmp.ne.s32.totalorder %s44_s17, %s379_s0  ;;  %p384_p6 = scmp.lt.s32.totalorder %s44_s17, %s44_s17 }
  0x2f   :  { %p385_p7 = scmp.lt.s32.totalorder %s383_s27, %s379_s0 }
  0x31   :  { %p386_p8 = por %p385_p7, %p384_p6 }
  0x33   :  { %p387_p9 = pnand %p386_p8, %p380_p5 }
  0x35   :  { %390 = shalt.err (!%p387_p9)
}
  0x36   :  { %46 = dma.hbm_to_vmem [thread:$0]  %s547_s2, 16, %s44_s17, [#allocation7]  }
  0x37   :  { %s391_s6 = scalar_lea.hbm %s548_s3, 16 }
  0x38   :  { %p392_p10 = scmp.ne.s32.totalorder %s548_s3, %s391_s6  ;;  %p395_p11 = scmp.lt.u32.totalorder %s391_s6, %s548_s3 }
  0x3a   :  { %p397_p12 = pnand %p395_p11, %p392_p10 }
  0x3c   :  { %400 = shalt.err (!%p397_p12)
}
  0x3d   :  { %s401_s11 = scalar_lea.vmem %s54_s19, 16  ;;  %s405_s12 = scalar_lea.vmem %s54_s19, 32 }
  0x3e   :  { %p402_p13 = scmp.ne.s32.totalorder %s54_s19, %s401_s11  ;;  %p406_p0 = scmp.lt.s32.totalorder %s54_s19, %s54_s19 }
  0x3f   :  { %p407_p1 = scmp.lt.s32.totalorder %s405_s12, %s401_s11 }
  0x41   :  { %p408_p2 = por %p407_p1, %p406_p0 }
  0x43   :  { %p409_p3 = pnand %p408_p2, %p402_p13 }
  0x45   :  { %412 = shalt.err (!%p409_p3)
}
  0x46   :  { %56 = dma.hbm_to_vmem [thread:$0]  %s548_s3, 16, %s54_s19, [#allocation10]  }
  0x47   :  { %435 = dma.done.wait [#allocation4], 256  }
  0x48   :  { %436 = vsyncadd [#allocation4], 4294967040 }
  0x49   :  { %437 = dma.done.wait [#allocation7], 1040  }
  0x4a   :  { %438 = vsyncadd [#allocation7], 4294966256 }
  0x4b   :  { %439 = dma.done.wait [#allocation10], 16  }
  0x4c   :  { %440 = vsyncadd [#allocation10], 4294967280  ;;  %v451_v0 = vmov 0.0   ;;  %vm452_vm0 = vmmov 0   ;;  %v315_v1 = vld [vmem:[#allocation6] sm:$0xff]   ;;  %v316_v2 = vld [vmem:[#allocation6 + $0x8] sm:$0xff]   ;;  %v228_v38 = vlaneseq }
  0x4d   :  { %284 = vmatprep.subr.bf16.mxu0 %v451_v0  ;;  %300 = vmatprep.mubr.msk.bf16.mxu0 %vm452_vm0, %v451_v0  ;;  %v317_v3 = vld [vmem:[#allocation6 + $0x10] sm:$0xff]   ;;  %v318_v4 = vld [vmem:[#allocation6 + $0x18] sm:$0xff]   ;;  %v319_v5 = vld [vmem:[#allocation6 + $0x20] sm:$0xff]   ;;  %s453_s3 = smov [#allocation11]  }
  0x4e   :  { %285 = vmatpush3.bf16.msra.mxu0 %v315_v1  ;;  %v320_v6 = vld [vmem:[#allocation6 + $0x28] sm:$0xff]   ;;  %v321_v7 = vld [vmem:[#allocation6 + $0x30] sm:$0xff]   ;;  %v322_v8 = vld [vmem:[#allocation6 + $0x38] sm:$0xff]   ;;  %v229_v39 = vshrl.u32 %v228_v38, 7  ;;  %s252_s15 = sshll.u32 %s453_s3, 4  ;;  %s253_s15 = int_to_ptr.vmem [resolvable:$true] %s252_s15 }
  0x4f   :  { %286 = vmatprep.subr.bf16.mxu0 %v451_v0  ;;  %v80_v9 = vld [vmem:[#allocation3] sm:$0xff]  ;;  %v81_v10 = vld [vmem:[#allocation3 + $0x8] sm:$0xff]  ;;  %v220_v40 = vld [vmem:[#allocation8] sm:$0x1]  ;;  %s413_s16 = scalar_lea.vmem %s253_s15, 256  ;;  %p418_p5 = scmp.lt.s32.totalorder %s253_s15, %s253_s15 }
  0x50   :  { %v84_v11 = vpack.c.bf16 %v81_v10, %v80_v9  ;;  %v230_v41 = vsub.s32 0, %v229_v39  ;;  %v224_v44 = vld [vmem:[#allocation9] sm:$0x1]  ;;  %p414_p4 = scmp.ne.s32.totalorder %s253_s15, %s413_s16  ;;  %p419_p6 = scmp.lt.s32.totalorder %s413_s16, %s413_s16 }
  0x52   :  { %287 = vmatpush3.bf16.msra.mxu0 %v316_v2  ;;  %p420_p7 = por %p419_p6, %p418_p5 }
  0x53   :  { %288 = vmatprep.subr.bf16.mxu0 %v451_v0 }
  0x54   :  { %p421_p8 = pnand %p420_p7, %p414_p4 }
  0x56   :  { %289 = vmatpush3.bf16.msra.mxu0 %v317_v3 }
  0x57   :  { %290 = vmatprep.subr.bf16.mxu0 %v451_v0 }
  0x5a   :  { %291 = vmatpush3.bf16.msra.mxu0 %v318_v4 }
  0x5b   :  { %292 = vmatprep.subr.bf16.mxu0 %v451_v0 }
  0x5e   :  { %293 = vmatpush3.bf16.msra.mxu0 %v319_v5 }
  0x5f   :  { %294 = vmatprep.subr.bf16.mxu0 %v451_v0 }
  0x62   :  { %295 = vmatpush3.bf16.msra.mxu0 %v320_v6 }
  0x63   :  { %296 = vmatprep.subr.bf16.mxu0 %v451_v0 }
  0x66   :  { %297 = vmatpush3.bf16.msra.mxu0 %v321_v7 }
  0x67   :  { %298 = vmatprep.subr.bf16.mxu0 %v451_v0 }
  0x6a   :  { %299 = vmatpush3.bf16.msra.mxu0 %v322_v8 }
  0x6d   :  { %301 = vmatmul.mubr.bf16.vlgmr.msra.gmra.mrb[0].mxu0 %v84_v11 }
 0x140   :  { %v183_v12 = vpop.f32.mrb[0].mxu0 }
 0x141   :  { %v302_v13 = vpop.f32.mrb[1].mxu0  ;;  %v207_v15 = vmul.f32 %v183_v12, %v183_v12 }
 0x142   :  { %v186_v14 = vpop.f32.mrb[2].mxu0 }
 0x143   :  { %v199_v16 = vadd.f32 %v186_v14, %v183_v12  ;;  %v208_v17 = vmul.f32 %v186_v14, %v186_v14  ;;  %v303_v18 = vpop.f32.mrb[3].mxu0 }
 0x145   :  { %v200_v19 = vrot.slane %v199_v16, 4  ;;  %v209_v20 = vadd.f32 %v208_v17, %v207_v15 }
 0x147   :  { %v201_v21 = vadd.f32 %v200_v19, %v199_v16  ;;  %v210_v22 = vrot.slane %v209_v20, 4 }
 0x149   :  { %v202_v23 = vrot.slane %v201_v21, 2  ;;  %v211_v24 = vadd.f32 %v210_v22, %v209_v20 }
 0x14b   :  { %v203_v25 = vadd.f32 %v202_v23, %v201_v21  ;;  %v212_v26 = vrot.slane %v211_v24, 2 }
 0x14d   :  { %v204_v27 = vrot.slane %v203_v25, 1  ;;  %v213_v28 = vadd.f32 %v212_v26, %v211_v24 }
 0x14f   :  { %v205_v29 = vadd.f32 %v204_v27, %v203_v25  ;;  %v214_v30 = vrot.slane %v213_v28, 1 }
 0x151   :  { %v206_v31 = vmul.f32 0.125, %v205_v29  ;;  %v215_v32 = vadd.f32 %v214_v30, %v213_v28 }
 0x153   :  { %v216_v33 = vmul.f32 0.125, %v215_v32  ;;  %v217_v34 = vmul.f32 %v206_v31, %v206_v31 }
 0x155   :  { %v218_v35 = vsub.f32 %v216_v33, %v217_v34 }
 0x157   :  { %v219_v36 = vmax.f32 %v218_v35, 0.0 }
 0x159   :  { %v221_v37 = vadd.f32 1e-06, %v219_v36 }
 0x15b   :  { %323 = vrsqrt.f32 %v221_v37 }
 0x165   :  { %v324_v42 = vpop.eup %323 }
 0x166   :  { %v223_v43 = vmul.f32 %v324_v42, %v220_v40 }
 0x168   :  { %v225_v45 = vmul.f32 %v223_v43, %v206_v31  ;;  %v231_v46 = vrot.slane %v223_v43, %v230_v41 }
 0x16a   :  { %v226_v47 = vsub.f32 %v224_v44, %v225_v45  ;;  %v233_v48 = vmul.f32 %v231_v46, %v183_v12  ;;  %v234_v49 = vmul.f32 %v231_v46, %v186_v14 }
 0x16c   :  { %v239_v50 = vrot.slane %v226_v47, %v230_v41 }
 0x16e   :  { %v242_v51 = vadd.f32 %v239_v50, %v234_v49  ;;  %v241_v52 = vadd.f32 %v239_v50, %v233_v48 }
 0x170   :  { %v243_v53 = vmax.f32 %v241_v52, 0.0  ;;  %v244_v54 = vmax.f32 %v242_v51, 0.0 }
 0x172   :  { %245 = vst [vmem:[#allocation11] sm:$0xff] %v243_v53  ;;  %246 = vst [vmem:[#allocation11 + $0x8] sm:$0xff] %v244_v54 }
 0x173   :  { %424 = shalt.err (!%p421_p8)
}
 0x174   :  { %s425_s19 = scalar_lea.hbm %s549_s4, 256 }
 0x175   :  { %p426_p9 = scmp.ne.s32.totalorder %s549_s4, %s425_s19  ;;  %p429_p10 = scmp.lt.u32.totalorder %s425_s19, %s549_s4 }
 0x177   :  { %p431_p11 = pnand %p429_p10, %p426_p9 }
 0x179   :  { %434 = shalt.err (!%p431_p11)
}
 0x17a   :  { %258 = dma.vmem_to_hbm [thread:$0]  %s253_s15, 256, %s549_s4, [#allocation5], %s447_s1, %s447_s1, %s448_s13  }
 0x17b   :  { %441 = dma.done.wait [#allocation5], 256  }
 0x17c   :  { %442 = vsyncadd [#allocation5], 4294967040 }
 0x17d   :  { %262 = vsyncpa [#allocation4], 1 }
 0x17e   :  { %263 = vsyncpa [#allocation7], 1 }
 0x17f   :  { %264 = vsyncpa [#allocation10], 1 }
 0x180   :  { %265 = vsyncpa [#allocation5], 1 }

</bundles_post_ra>
